<compile_context>
chip_gen: v5e
topology: v5e:2x2
jax: 0.10.0
libtpu: 0.0.40
codegen_flags: <defaults>
</compile_context>

<pallas_src>
import jax
import jax.numpy as jnp
from jax.experimental import pallas as pl
from jax.experimental.pallas import tpu as pltpu


def hdit_mlp_kernel(x_ref, wu_ref, wv_ref, bu_ref, bv_ref, wout_ref, bout_ref,
                    o_ref, acc_ref):
    # x_ref:    (tm, D)        resident across the k axis
    # wu_ref:   (D, tk)        wv_ref: (D, tk)
    # bu_ref:   (1, tk) f32    bv_ref: (1, tk) f32
    # wout_ref: (tk, D)        bout_ref: (1, D) f32
    # o_ref:    (tm, D)        acc_ref: (tm, D) f32 scratch
    k = pl.program_id(1)

    @pl.when(k == 0)
    def _init():
        acc_ref[...] = jnp.zeros_like(acc_ref)

    x = x_ref[...]
    # u_k / v_k column tiles of the fused uv projection, accumulated in f32.
    u = jnp.dot(x, wu_ref[...], preferred_element_type=jnp.float32) + bu_ref[...]
    v = jnp.dot(x, wv_ref[...], preferred_element_type=jnp.float32) + bv_ref[...]

    # TODO(synk): training-mode dropout (pltpu.prng_seed + stateful_bernoulli)
    # not implemented; eval-mode dropout is the identity.
    h = (u * v).astype(wout_ref.dtype)

    acc_ref[...] += jnp.dot(h, wout_ref[...], preferred_element_type=jnp.float32)

    @pl.when(k == pl.num_programs(1) - 1)
    def _finalize():
        out = x_ref[...].astype(jnp.float32) + acc_ref[...] + bout_ref[...]
        o_ref[...] = out.astype(o_ref.dtype)


def _round_up(a, b):
    return ((a + b - 1) // b) * b


def hdit_mlp(x, w_uv, b_uv, w_out, b_out, *, tm=256, tk=512, compute_dtype=None):
    """x: [B, N, D]; w_uv: [D, 8D]; b_uv: [8D]; w_out: [4D, D]; b_out: [D].

    compute_dtype: optional dtype (e.g. jnp.bfloat16) for the matmul operands;
    accumulation / elementwise stays f32 and the output keeps x's dtype.
    """
    orig_dtype = x.dtype
    B, N, D = x.shape
    H = 4 * D
    assert w_uv.shape == (D, 2 * H)
    assert w_out.shape == (H, D)

    if compute_dtype is not None:
        x = x.astype(compute_dtype)
        w_uv = w_uv.astype(compute_dtype)
        w_out = w_out.astype(compute_dtype)

    # Split the fused uv projection into u / v halves so the hidden dim can be
    # tiled with one column-tile index_map per half.
    w_u = w_uv[:, :H]
    w_v = w_uv[:, H:]
    b_u = b_uv[:H].astype(jnp.float32).reshape(1, H)
    b_v = b_uv[H:].astype(jnp.float32).reshape(1, H)
    b_out2 = b_out.astype(jnp.float32).reshape(1, D)

    M = B * N
    x2 = x.reshape(M, D)

    # Token tile: clamp for tiny inputs, then pad M so the grid divides evenly
    # (padded rows are sliced off after the call).
    tm = min(tm, _round_up(M, 8))
    assert tm % 8 == 0
    M_pad = _round_up(M, tm)
    if M_pad != M:
        x2 = jnp.pad(x2, ((0, M_pad - M), (0, 0)))

    # Hidden-dim tile: multiple of 128 lanes (or the whole hidden dim).
    tk = min(tk, H)
    assert H % tk == 0 and (tk % 128 == 0 or tk == H), (
        "hidden tile must be a multiple of 128 lanes or the full hidden dim")
    # NOTE: D is presented as a full (untiled) last dim; for real HDiT widths
    # (D a multiple of 128) output stores are lane-dense (no masked vst).

    grid = (M_pad // tm, H // tk)

    itemsize = jnp.dtype(x.dtype).itemsize
    flops = 24 * M_pad * D * D          # 2*M*D*8D + 2*M*4D*D
    bytes_accessed = int((2 * M_pad * D + 12 * D * D) * itemsize + (9 * D) * 4)

    # VMEM budget: double-buffered x/out/weight tiles + biases + f32 accumulator
    # + u/v/h temporaries; cap at 64 MiB so the config is legal on v7x.
    vmem_bytes = (
        2 * (2 * tm * D + 2 * D * tk + tk * D) * itemsize
        + 2 * (2 * tk + D) * 4
        + tm * D * 4
        + 3 * tm * tk * 4
    )
    vmem_limit = int(min(64 * 1024 * 1024, max(32 * 1024 * 1024, 2 * vmem_bytes)))

    out = pl.pallas_call(
        hdit_mlp_kernel,
        out_shape=jax.ShapeDtypeStruct((M_pad, D), orig_dtype),
        grid_spec=pltpu.PrefetchScalarGridSpec(
            num_scalar_prefetch=0,
            grid=grid,
            in_specs=[
                pl.BlockSpec((tm, D), lambda i, k: (i, 0)),    # x tile
                pl.BlockSpec((D, tk), lambda i, k: (0, k)),    # W_u column tile
                pl.BlockSpec((D, tk), lambda i, k: (0, k)),    # W_v column tile
                pl.BlockSpec((1, tk), lambda i, k: (0, k)),    # b_u tile
                pl.BlockSpec((1, tk), lambda i, k: (0, k)),    # b_v tile
                pl.BlockSpec((tk, D), lambda i, k: (k, 0)),    # W_out row tile
                pl.BlockSpec((1, D), lambda i, k: (0, 0)),     # b_out
            ],
            out_specs=pl.BlockSpec((tm, D), lambda i, k: (i, 0)),
            scratch_shapes=[pltpu.VMEM((tm, D), jnp.float32)],
        ),
        compiler_params=pltpu.CompilerParams(
            dimension_semantics=("parallel", "arbitrary"),
            vmem_limit_bytes=vmem_limit,
        ),
        cost_estimate=pl.CostEstimate(
            flops=flops, transcendentals=0, bytes_accessed=bytes_accessed),
    )(x2, w_u, w_v, b_u, b_v, w_out, b_out2)

    return out[:M].reshape(B, N, D)


def ref_forward(x, w_uv, b_uv, w_out, b_out):
    xf = x.astype(jnp.float32)
    uv = xf @ w_uv.astype(jnp.float32) + b_uv.astype(jnp.float32)
    H = w_out.shape[0]
    u, v = uv[..., :H], uv[..., H:]
    return xf + (u * v) @ w_out.astype(jnp.float32) + b_out.astype(jnp.float32)


if __name__ == "__main__":
    D = 64                               # d_model
    key = jax.random.PRNGKey(0)
    kx, kx2, k1, k2, k3, k4 = jax.random.split(key, 6)

    # Parameter shapes follow HDiTMLP.__init__ (weights stored pre-transposed).
    # NOTE: __init__ zeros fc_out.weight; we use small random values instead so
    # the second matmul path is actually exercised numerically.
    bound_uv = 1.0 / jnp.sqrt(jnp.float32(D))
    bound_out = 1.0 / jnp.sqrt(jnp.float32(4 * D))
    w_uv = jax.random.uniform(k1, (D, 8 * D), jnp.float32, -bound_uv, bound_uv)
    b_uv = jax.random.uniform(k2, (8 * D,), jnp.float32, -bound_uv, bound_uv)
    w_out = jax.random.uniform(k3, (4 * D, D), jnp.float32, -bound_out, bound_out)
    b_out = jax.random.uniform(k4, (D,), jnp.float32, -bound_out, bound_out)

    # Run 1: f32 compute, default tiles (grid reduces over the hidden dim).
    x = jax.random.normal(kx, (2, 8, D), dtype=jnp.float32)
    out = jax.block_until_ready(hdit_mlp(x, w_uv, b_uv, w_out, b_out))
    ref = ref_forward(x, w_uv, b_uv, w_out, b_out)
    assert out.shape == x.shape
    assert jnp.allclose(out, ref, atol=1e-4, rtol=1e-4), "f32 mismatch vs reference"

    # Run 2: ragged token count -> exercises M padding and multiple token tiles.
    x_ragged = jax.random.normal(kx2, (2, 7, D), dtype=jnp.float32)
    out2 = jax.block_until_ready(
        hdit_mlp(x_ragged, w_uv, b_uv, w_out, b_out, tm=8, tk=128))
    ref2 = ref_forward(x_ragged, w_uv, b_uv, w_out, b_out)
    assert out2.shape == x_ragged.shape
    assert jnp.allclose(out2, ref2, atol=1e-4, rtol=1e-4), "padded mismatch vs reference"

    # Run 3: bf16 matmul operands (f32 accumulation), looser tolerance.
    out3 = jax.block_until_ready(
        hdit_mlp(x, w_uv, b_uv, w_out, b_out, compute_dtype=jnp.bfloat16))
    assert jnp.allclose(out3, ref, atol=5e-2, rtol=5e-2), "bf16 mismatch vs reference"

    print("KERNEL_OK")
</pallas_src>

<mosaic_0001>
module attributes {stable_mosaic.version = 11 : i64} {
  func.func @hdit_mlp_kernel(%arg0: i32, %arg1: i32, %arg2: memref<16x64xf32, #tpu.memory_space<vmem>>, %arg3: memref<64x256xf32, #tpu.memory_space<vmem>>, %arg4: memref<64x256xf32, #tpu.memory_space<vmem>>, %arg5: memref<1x256xf32, #tpu.memory_space<vmem>>, %arg6: memref<1x256xf32, #tpu.memory_space<vmem>>, %arg7: memref<256x64xf32, #tpu.memory_space<vmem>>, %arg8: memref<1x64xf32, #tpu.memory_space<vmem>>, %arg9: memref<16x64xf32, #tpu.memory_space<vmem>>, %arg10: memref<16x64xf32, #tpu.memory_space<vmem>>) attributes {dimension_semantics = [#tpu.dimension_semantics<parallel>, #tpu.dimension_semantics<arbitrary>], iteration_bounds = array<i64: 1, 1>, scalar_prefetch = 0 : i64, scratch_operands = 1 : i64, tpu.core_type = #tpu.core_type<tc>, window_params = [{transform_indices = @transform_0, window_bounds = array<i64: 16, 64>}, {transform_indices = @transform_1, window_bounds = array<i64: 64, 256>}, {transform_indices = @transform_2, window_bounds = array<i64: 64, 256>}, {transform_indices = @transform_3, window_bounds = array<i64: 1, 256>}, {transform_indices = @transform_4, window_bounds = array<i64: 1, 256>}, {transform_indices = @transform_5, window_bounds = array<i64: 256, 64>}, {pipeline_mode = #tpu.pipeline_mode<synchronous>, transform_indices = @transform_6, window_bounds = array<i64: 1, 64>}, {transform_indices = @transform_7, window_bounds = array<i64: 16, 64>}]} {
    %c0_i32 = arith.constant 0 : i32
    %0 = arith.cmpi eq, %arg1, %c0_i32 : i32
    %1 = arith.extui %0 : i1 to i32
    %c0_i32_0 = arith.constant 0 : i32
    %2 = arith.cmpi ne, %1, %c0_i32_0 : i32
    scf.if %2 {
      %cst_20 = arith.constant 0.000000e+00 : f32
      %23 = vector.broadcast %cst_20 : f32 to vector<16x64xf32>
      %c0_21 = arith.constant 0 : index
      %c0_22 = arith.constant 0 : index
      %24 = vector.load %arg10[%c0_21, %c0_22] : memref<16x64xf32, #tpu.memory_space<vmem>>, vector<16x64xf32>
      tpu.vector_store %arg10[%c0_21, %c0_22], %23 {strides = array<i32>} : memref<16x64xf32, #tpu.memory_space<vmem>>, vector<16x64xf32>,
    } else {
    }
    %c0 = arith.constant 0 : index
    %c0_1 = arith.constant 0 : index
    %3 = vector.load %arg2[%c0, %c0_1] : memref<16x64xf32, #tpu.memory_space<vmem>>, vector<16x64xf32>
    %c0_2 = arith.constant 0 : index
    %c0_3 = arith.constant 0 : index
    %4 = vector.load %arg3[%c0_2, %c0_3] : memref<64x256xf32, #tpu.memory_space<vmem>>, vector<64x256xf32>
    %cst = arith.constant dense<0.000000e+00> : vector<16x256xf32>
    %5 = tpu.matmul %3, %4, %cst {dimension_numbers = #tpu.dot_dimension_numbers<[1], [0], [0], [1], [0, 0, 1, 1], [], []>} : vector<16x64xf32>, vector<64x256xf32>, vector<16x256xf32> -> vector<16x256xf32>
    %c0_4 = arith.constant 0 : index
    %c0_5 = arith.constant 0 : index
    %6 = vector.load %arg5[%c0_4, %c0_5] : memref<1x256xf32, #tpu.memory_space<vmem>>, vector<1x256xf32>
    %7 = vector.broadcast %6 : vector<1x256xf32> to vector<16x256xf32>
    %8 = arith.addf %5, %7 : vector<16x256xf32>
    %c0_6 = arith.constant 0 : index
    %c0_7 = arith.constant 0 : index
    %9 = vector.load %arg4[%c0_6, %c0_7] : memref<64x256xf32, #tpu.memory_space<vmem>>, vector<64x256xf32>
    %cst_8 = arith.constant dense<0.000000e+00> : vector<16x256xf32>
    %10 = tpu.matmul %3, %9, %cst_8 {dimension_numbers = #tpu.dot_dimension_numbers<[1], [0], [0], [1], [0, 0, 1, 1], [], []>} : vector<16x64xf32>, vector<64x256xf32>, vector<16x256xf32> -> vector<16x256xf32>
    %c0_9 = arith.constant 0 : index
    %c0_10 = arith.constant 0 : index
    %11 = vector.load %arg6[%c0_9, %c0_10] : memref<1x256xf32, #tpu.memory_space<vmem>>, vector<1x256xf32>
    %12 = vector.broadcast %11 : vector<1x256xf32> to vector<16x256xf32>
    %13 = arith.addf %10, %12 : vector<16x256xf32>
    %14 = arith.mulf %8, %13 : vector<16x256xf32>
    %c0_11 = arith.constant 0 : index
    %c0_12 = arith.constant 0 : index
    %15 = vector.load %arg10[%c0_11, %c0_12] : memref<16x64xf32, #tpu.memory_space<vmem>>, vector<16x64xf32>
    %c0_13 = arith.constant 0 : index
    %c0_14 = arith.constant 0 : index
    %16 = vector.load %arg7[%c0_13, %c0_14] : memref<256x64xf32, #tpu.memory_space<vmem>>, vector<256x64xf32>
    %cst_15 = arith.constant dense<0.000000e+00> : vector<16x64xf32>
    %17 = tpu.matmul %14, %16, %cst_15 {dimension_numbers = #tpu.dot_dimension_numbers<[1], [0], [0], [1], [0, 0, 1, 1], [], []>} : vector<16x256xf32>, vector<256x64xf32>, vector<16x64xf32> -> vector<16x64xf32>
    %18 = arith.addf %15, %17 : vector<16x64xf32>
    %c0_16 = arith.constant 0 : index
    %c0_17 = arith.constant 0 : index
    %19 = vector.load %arg10[%c0_16, %c0_17] : memref<16x64xf32, #tpu.memory_space<vmem>>, vector<16x64xf32>
    tpu.vector_store %arg10[%c0_16, %c0_17], %18 {strides = array<i32>} : memref<16x64xf32, #tpu.memory_space<vmem>>, vector<16x64xf32>,
    %c0_i32_18 = arith.constant 0 : i32
    %20 = arith.cmpi eq, %arg1, %c0_i32_18 : i32
    %21 = arith.extui %20 : i1 to i32
    %c0_i32_19 = arith.constant 0 : i32
    %22 = arith.cmpi ne, %21, %c0_i32_19 : i32
    scf.if %22 {
      %c0_20 = arith.constant 0 : index
      %c0_21 = arith.constant 0 : index
      %23 = vector.load %arg2[%c0_20, %c0_21] : memref<16x64xf32, #tpu.memory_space<vmem>>, vector<16x64xf32>
      %c0_22 = arith.constant 0 : index
      %c0_23 = arith.constant 0 : index
      %24 = vector.load %arg10[%c0_22, %c0_23] : memref<16x64xf32, #tpu.memory_space<vmem>>, vector<16x64xf32>
      %25 = arith.addf %23, %24 : vector<16x64xf32>
      %c0_24 = arith.constant 0 : index
      %c0_25 = arith.constant 0 : index
      %26 = vector.load %arg8[%c0_24, %c0_25] : memref<1x64xf32, #tpu.memory_space<vmem>>, vector<1x64xf32>
      %27 = vector.broadcast %26 : vector<1x64xf32> to vector<16x64xf32>
      %28 = arith.addf %25, %27 : vector<16x64xf32>
      %c0_26 = arith.constant 0 : index
      %c0_27 = arith.constant 0 : index
      %29 = vector.load %arg9[%c0_26, %c0_27] : memref<16x64xf32, #tpu.memory_space<vmem>>, vector<16x64xf32>
      tpu.vector_store %arg9[%c0_26, %c0_27], %28 {strides = array<i32>} : memref<16x64xf32, #tpu.memory_space<vmem>>, vector<16x64xf32>,
    } else {
    }
    return
  }
  func.func @transform_0(%arg0: i32, %arg1: i32) -> (i32, i32) {
    %c0_i32 = arith.constant 0 : i32
    %c0_i32_0 = arith.constant 0 : i32
    return %arg0, %c0_i32 : i32, i32
  }
  func.func @transform_1(%arg0: i32, %arg1: i32) -> (i32, i32) {
    %c0_i32 = arith.constant 0 : i32
    %c0_i32_0 = arith.constant 0 : i32
    return %c0_i32, %arg1 : i32, i32
  }
  func.func @transform_2(%arg0: i32, %arg1: i32) -> (i32, i32) {
    %c0_i32 = arith.constant 0 : i32
    %c0_i32_0 = arith.constant 0 : i32
    return %c0_i32, %arg1 : i32, i32
  }
  func.func @transform_3(%arg0: i32, %arg1: i32) -> (i32, i32) {
    %c0_i32 = arith.constant 0 : i32
    %c0_i32_0 = arith.constant 0 : i32
    return %c0_i32, %arg1 : i32, i32
  }
  func.func @transform_4(%arg0: i32, %arg1: i32) -> (i32, i32) {
    %c0_i32 = arith.constant 0 : i32
    %c0_i32_0 = arith.constant 0 : i32
    return %c0_i32, %arg1 : i32, i32
  }
  func.func @transform_5(%arg0: i32, %arg1: i32) -> (i32, i32) {
    %c0_i32 = arith.constant 0 : i32
    %c0_i32_0 = arith.constant 0 : i32
    return %arg1, %c0_i32 : i32, i32
  }
  func.func @transform_6(%arg0: i32, %arg1: i32) -> (i32, i32) {
    %c0_i32 = arith.constant 0 : i32
    %c0_i32_0 = arith.constant 0 : i32
    %c0_i32_1 = arith.constant 0 : i32
    return %c0_i32, %c0_i32_0 : i32, i32
  }
  func.func @transform_7(%arg0: i32, %arg1: i32) -> (i32, i32) {
    %c0_i32 = arith.constant 0 : i32
    %c0_i32_0 = arith.constant 0 : i32
    return %arg0, %c0_i32 : i32, i32
  }
}

</mosaic_0001>

<bundles_post_ra>
// kernel: tpu_custom_call.1
= control target key start
LH: loop header
LB: loop body
LE: loop exit
PB: predicated region body
PF: predicated region fallthrough
CT: control target
= control target key end

     0   :  { %vm31_vm0 = vcmask 523264   ;;  %s623_s0 = inlined_call_operand.vmem [shape: f32[16,64], index: 0, kind: input, shape index: {}]   ;;  %s624_s1 = inlined_call_operand.vmem [shape: f32[64,256], index: 1, kind: input, shape index: {}]   ;;  %s625_s2 = inlined_call_operand.vmem [shape: f32[64,256], index: 2, kind: input, shape index: {}]   ;;  %s626_s3 = inlined_call_operand.vmem [shape: f32[1,256], index: 3, kind: input, shape index: {}]   ;;  %s627_s4 = inlined_call_operand.vmem [shape: f32[1,256], index: 4, kind: input, shape index: {}]   ;;  %s628_s5 = inlined_call_operand.vmem [shape: f32[256,64], index: 5, kind: input, shape index: {}]   ;;  %s629_s6 = inlined_call_operand.vmem [shape: f32[1,64], index: 6, kind: input, shape index: {}]   ;;  %s630_s7 = inlined_call_operand.hbm [shape: f32[16,64], index: 7, kind: output, shape index: {}]  }
   0x1   :  { %v50_v0 = vld [vmem:[%s624_s1 + $0x70] sm:$0xff]  ;;  %v51_v1 = vld [vmem:[%s624_s1 + $0x78] sm:$0xff]  ;;  %v48_v2 = vld [vmem:[%s624_s1 + $0x60] sm:$0xff] }
   0x2   :  { %73 = vmatpush.msra.mxu2 %v50_v0  ;;  %96 = vmatpush.msra.mxu3 %v51_v1  ;;  %v49_v3 = vld [vmem:[%s624_s1 + $0x68] sm:$0xff]  ;;  %v46_v4 = vld [vmem:[%s624_s1 + $0x50] sm:$0xff]  ;;  %v47_v5 = vld [vmem:[%s624_s1 + $0x58] sm:$0xff] }
   0x3   :  { %v44_v6 = vld [vmem:[%s624_s1 + $0x40] sm:$0xff]  ;;  %v45_v7 = vld [vmem:[%s624_s1 + $0x48] sm:$0xff]  ;;  %v42_v8 = vld [vmem:[%s624_s1 + $0x30] sm:$0xff] }
   0x4   :  { %74 = vmatpush.msra.mxu2 %v48_v2  ;;  %97 = vmatpush.msra.mxu3 %v49_v3  ;;  %v43_v9 = vld [vmem:[%s624_s1 + $0x38] sm:$0xff]  ;;  %v40_v10 = vld [vmem:[%s624_s1 + $0x20] sm:$0xff]  ;;  %v41_v11 = vld [vmem:[%s624_s1 + $0x28] sm:$0xff] }
   0x5   :  { %v38_v12 = vld [vmem:[%s624_s1 + $0x10] sm:$0xff]  ;;  %v39_v13 = vld [vmem:[%s624_s1 + $0x18] sm:$0xff]  ;;  %v36_v14 = vld [vmem:[%s624_s1] sm:$0xff] }
   0x6   :  { %75 = vmatpush.msra.mxu2 %v46_v4  ;;  %98 = vmatpush.msra.mxu3 %v47_v5  ;;  %v200_v15 = vld [vmem:[%s628_s5 + $0x78] sm:$0xff]  ;;  %v37_v17 = vld [vmem:[%s624_s1 + $0x8] sm:$0xff]  ;;  %v199_v18 = vld [vmem:[%s628_s5 + $0x70] sm:$0xff] }
   0x7   :  { %v216_v16 = vld [vmem:[%s628_s5 + $0xf8] sm:$0xff]  ;;  %217 = vmatpush.msra.mxu0 %v200_v15  ;;  %v215_v19 = vld [vmem:[%s628_s5 + $0xf0] sm:$0xff]  ;;  %v448_v20 = vld [vmem:[%s623_s0] sm:$0xff] }
   0x8   :  { %76 = vmatpush.msra.mxu2 %v44_v6  ;;  %99 = vmatpush.msra.mxu3 %v45_v7  ;;  %v125_v21 = vld [vmem:[%s625_s2 + $0x70] sm:$0xff]  ;;  %v126_v22 = vld [vmem:[%s625_s2 + $0x78] sm:$0xff]  ;;  %v198_v23 = vld [vmem:[%s628_s5 + $0x68] sm:$0xff] }
   0x9   :  { %240 = vmatpush.msra.mxu1 %v216_v16  ;;  %218 = vmatpush.msra.mxu0 %v199_v18  ;;  %v214_v24 = vld [vmem:[%s628_s5 + $0xe8] sm:$0xff] }
   0xa   :  { %77 = vmatpush.msra.mxu2 %v42_v8  ;;  %100 = vmatpush.msra.mxu3 %v43_v9 }
   0xb   :  { %241 = vmatpush.msra.mxu1 %v215_v19 }
   0xc   :  { %78 = vmatpush.msra.mxu2 %v40_v10  ;;  %101 = vmatpush.msra.mxu3 %v41_v11 }
   0xe   :  { %79 = vmatpush.msra.mxu2 %v38_v12  ;;  %102 = vmatpush.msra.mxu3 %v39_v13 }
  0x10   :  { %80 = vmatpush.msra.mxu2 %v36_v14  ;;  %103 = vmatpush.msra.mxu3 %v37_v17 }
  0x11   :  { %12 = vsyncpa [#allocation4], 0  ;;  %302 = vmatmul.msk.f32.vlgmr.msra.gmra.mxu2 %vm31_vm0, %v448_v20  ;;  %304 = vmatmul.msk.f32.vlgmr.msra.gmra.mxu3 %vm31_vm0, %v448_v20  ;;  %v123_v25 = vld [vmem:[%s625_s2 + $0x60] sm:$0xff]  ;;  %v124_v26 = vld [vmem:[%s625_s2 + $0x68] sm:$0xff]  ;;  %s290_s16 = sshll.u32 %s630_s7, 4  ;;  %s344_s17 = smov 8   ;;  %s291_s16 = int_to_ptr.hbm [resolvable:$true] %s290_s16 }
  0x12   :  { %141 = vmatpush.msrb.mxu2 %v125_v21  ;;  %164 = vmatpush.msrb.mxu3 %v126_v22  ;;  %v197_v27 = vld [vmem:[%s628_s5 + $0x60] sm:$0xff]  ;;  %v121_v29 = vld [vmem:[%s625_s2 + $0x50] sm:$0xff]  ;;  %v122_v30 = vld [vmem:[%s625_s2 + $0x58] sm:$0xff] }
  0x13   :  { %v213_v28 = vld [vmem:[%s628_s5 + $0xe0] sm:$0xff]  ;;  %219 = vmatpush.msra.mxu0 %v198_v23  ;;  %242 = vmatpush.msra.mxu1 %v214_v24  ;;  %v196_v31 = vld [vmem:[%s628_s5 + $0x58] sm:$0xff]  ;;  %v120_v34 = vld [vmem:[%s625_s2 + $0x48] sm:$0xff] }
  0x14   :  { %142 = vmatpush.msrb.mxu2 %v123_v25  ;;  %165 = vmatpush.msrb.mxu3 %v124_v26  ;;  %v212_v32 = vld [vmem:[%s628_s5 + $0xd8] sm:$0xff]  ;;  %v119_v33 = vld [vmem:[%s625_s2 + $0x40] sm:$0xff]  ;;  %v499_v35 = vld [vmem:[%s623_s0 + $0x8] sm:$0xff] }
  0x15   :  { %220 = vmatpush.msra.mxu0 %v197_v27  ;;  %243 = vmatpush.msra.mxu1 %v213_v28  ;;  %v117_v36 = vld [vmem:[%s625_s2 + $0x30] sm:$0xff]  ;;  %v118_v37 = vld [vmem:[%s625_s2 + $0x38] sm:$0xff]  ;;  %v115_v38 = vld [vmem:[%s625_s2 + $0x20] sm:$0xff] }
  0x16   :  { %143 = vmatpush.msrb.mxu2 %v121_v29  ;;  %166 = vmatpush.msrb.mxu3 %v122_v30  ;;  %v116_v39 = vld [vmem:[%s625_s2 + $0x28] sm:$0xff]  ;;  %v113_v40 = vld [vmem:[%s625_s2 + $0x10] sm:$0xff]  ;;  %v114_v41 = vld [vmem:[%s625_s2 + $0x18] sm:$0xff]  ;;  %v341_v29 = vmov 0.0  }
  0x17   :  { %221 = vmatpush.msra.mxu0 %v196_v31  ;;  %244 = vmatpush.msra.mxu1 %v212_v32  ;;  %v111_v42 = vld [vmem:[%s625_s2] sm:$0xff]  ;;  %v112_v43 = vld [vmem:[%s625_s2 + $0x8] sm:$0xff]  ;;  %v195_v44 = vld [vmem:[%s628_s5 + $0x50] sm:$0xff]  ;;  %32 = vst.msk [vmem:[#allocation2] sm:$0xff] %vm31_vm0, %v341_v29 }
  0x18   :  { %144 = vmatpush.msrb.mxu2 %v119_v33  ;;  %167 = vmatpush.msrb.mxu3 %v120_v34  ;;  %v211_v45 = vld [vmem:[%s628_s5 + $0xd0] sm:$0xff]  ;;  %v194_v46 = vld [vmem:[%s628_s5 + $0x48] sm:$0xff]  ;;  %v193_v48 = vld [vmem:[%s628_s5 + $0x40] sm:$0xff]  ;;  %33 = vst.msk [vmem:[#allocation2 + $0x8] sm:$0xff] %vm31_vm0, %v341_v29 }
  0x19   :  { %303 = vmatmul.msk.f32.gmra.mxu2 %vm31_vm0, %v499_v35  ;;  %305 = vmatmul.msk.f32.gmra.mxu3 %vm31_vm0, %v499_v35  ;;  %v210_v47 = vld [vmem:[%s628_s5 + $0xc8] sm:$0xff]  ;;  %v209_v49 = vld [vmem:[%s628_s5 + $0xc0] sm:$0xff]  ;;  %v192_v50 = vld [vmem:[%s628_s5 + $0x38] sm:$0xff] }
  0x1a   :  { %145 = vmatpush.msrb.mxu2 %v117_v36  ;;  %168 = vmatpush.msrb.mxu3 %v118_v37  ;;  %v208_v51 = vld [vmem:[%s628_s5 + $0xb8] sm:$0xff]  ;;  %v191_v52 = vld [vmem:[%s628_s5 + $0x30] sm:$0xff]  ;;  %v190_v54 = vld [vmem:[%s628_s5 + $0x28] sm:$0xff] }
  0x1b   :  { %222 = vmatpush.msra.mxu0 %v195_v44  ;;  %245 = vmatpush.msra.mxu1 %v211_v45  ;;  %v207_v53 = vld [vmem:[%s628_s5 + $0xb0] sm:$0xff]  ;;  %v206_v55 = vld [vmem:[%s628_s5 + $0xa8] sm:$0xff]  ;;  %v189_v56 = vld [vmem:[%s628_s5 + $0x20] sm:$0xff] }
  0x1c   :  { %146 = vmatpush.msrb.mxu2 %v115_v38  ;;  %169 = vmatpush.msrb.mxu3 %v116_v39  ;;  %v205_v57 = vld [vmem:[%s628_s5 + $0xa0] sm:$0xff]  ;;  %v188_v58 = vld [vmem:[%s628_s5 + $0x18] sm:$0xff]  ;;  %v187_v60 = vld [vmem:[%s628_s5 + $0x10] sm:$0xff] }
  0x1d   :  { %223 = vmatpush.msra.mxu0 %v194_v46  ;;  %246 = vmatpush.msra.mxu1 %v210_v47  ;;  %v204_v59 = vld [vmem:[%s628_s5 + $0x98] sm:$0xff]  ;;  %v203_v61 = vld [vmem:[%s628_s5 + $0x90] sm:$0xff]  ;;  %v186_v62 = vld [vmem:[%s628_s5 + $0x8] sm:$0xff] }
  0x1e   :  { %147 = vmatpush.msrb.mxu2 %v113_v40  ;;  %170 = vmatpush.msrb.mxu3 %v114_v41  ;;  %v202_v63 = vld [vmem:[%s628_s5 + $0x88] sm:$0xff]  ;;  %v185_v0 = vld [vmem:[%s628_s5] sm:$0xff] }
  0x1f   :  { %224 = vmatpush.msra.mxu0 %v193_v48  ;;  %247 = vmatpush.msra.mxu1 %v209_v49  ;;  %v201_v1 = vld [vmem:[%s628_s5 + $0x80] sm:$0xff]  ;;  %v184_v37 = vld [vmem:[#allocation2 + $0x8] sm:$0xff]  ;;  %s342_s5 = smov [#allocation3]  }
  0x20   :  { %148 = vmatpush.msrb.mxu2 %v111_v42  ;;  %171 = vmatpush.msrb.mxu3 %v112_v43  ;;  %v52_v6 = vld [vmem:[%s626_s3] sm:$0x3]  ;;  %s288_s13 = sshll.u32 %s342_s5, 4  ;;  %s289_s13 = int_to_ptr.vmem [resolvable:$true] %s288_s13 }
  0x21   :  { %306 = vmatmul.msk.f32.vlgmr.msrb.gmra.mxu2 %vm31_vm0, %v448_v20  ;;  %308 = vmatmul.msk.f32.vlgmr.msrb.gmra.mxu3 %vm31_vm0, %v448_v20  ;;  %v127_v7 = vld [vmem:[%s627_s4] sm:$0x3]  ;;  %v54_v8 = vperm.slane %v52_v6, 0  ;;  %v55_v9 = vperm.slane %v52_v6, 1 }
  0x22   :  { %225 = vmatpush.msra.mxu0 %v192_v50  ;;  %248 = vmatpush.msra.mxu1 %v208_v51  ;;  %v129_v10 = vperm.slane %v127_v7, 0  ;;  %v130_v11 = vperm.slane %v127_v7, 1  ;;  %v183_v31 = vld [vmem:[#allocation2] sm:$0xff] }
  0x23   :  { %v314_v41 = vld [vmem:[%s629_s6] ss:$0 sm:$0xff]  ;;  %s343_s6 = smov 128  }
  0x24   :  { %226 = vmatpush.msra.mxu0 %v191_v52  ;;  %249 = vmatpush.msra.mxu1 %v207_v53 }
  0x26   :  { %227 = vmatpush.msra.mxu0 %v190_v54  ;;  %250 = vmatpush.msra.mxu1 %v206_v55 }
  0x28   :  { %228 = vmatpush.msra.mxu0 %v189_v56  ;;  %251 = vmatpush.msra.mxu1 %v205_v57 }
  0x29   :  { %307 = vmatmul.msk.f32.gmra.mxu2 %vm31_vm0, %v499_v35  ;;  %309 = vmatmul.msk.f32.gmra.mxu3 %vm31_vm0, %v499_v35 }
  0x2a   :  { %229 = vmatpush.msra.mxu0 %v188_v58  ;;  %252 = vmatpush.msra.mxu1 %v204_v59 }
  0x2c   :  { %230 = vmatpush.msra.mxu0 %v187_v60  ;;  %253 = vmatpush.msra.mxu1 %v203_v61 }
  0x2e   :  { %231 = vmatpush.msra.mxu0 %v186_v62  ;;  %254 = vmatpush.msra.mxu1 %v202_v63 }
  0x30   :  { %232 = vmatpush.msra.mxu0 %v185_v0  ;;  %255 = vmatpush.msra.mxu1 %v201_v1 }
  0x94   :  { %v82_v2 = vpop.f32.mrf.mxu2  ;;  %v105_v3 = vpop.f32.mrf.mxu3 }
  0x95   :  { %v83_v14 = vadd.f32 %v82_v2, %v54_v8  ;;  %v106_v15 = vadd.f32 %v105_v3, %v55_v9 }
  0x9c   :  { %v85_v4 = vpop.f32.mrf.mxu2  ;;  %v108_v5 = vpop.f32.mrf.mxu3 }
  0x9d   :  { %v86_v23 = vadd.f32 %v85_v4, %v54_v8  ;;  %v109_v24 = vadd.f32 %v108_v5, %v55_v9 }
  0xa4   :  { %v150_v12 = vpop.f32.mrf.mxu2  ;;  %v173_v13 = vpop.f32.mrf.mxu3 }
  0xa5   :  { %v151_v16 = vadd.f32 %v150_v12, %v129_v10  ;;  %v174_v17 = vadd.f32 %v173_v13, %v130_v11 }
  0xa7   :  { %v179_v18 = vmul.f32 %v151_v16, %v83_v14  ;;  %v180_v19 = vmul.f32 %v174_v17, %v106_v15 }
  0xa9   :  { %233 = vmatmul.f32.vlgmr.msra.gmra.mxu0 %v179_v18  ;;  %256 = vmatmul.f32.vlgmr.msra.gmra.mxu1 %v180_v19 }
  0xac   :  { %v153_v21 = vpop.f32.mrf.mxu2  ;;  %v176_v22 = vpop.f32.mrf.mxu3 }
  0xad   :  { %v154_v25 = vadd.f32 %v153_v21, %v129_v10  ;;  %v177_v26 = vadd.f32 %v176_v22, %v130_v11 }
  0xaf   :  { %v181_v27 = vmul.f32 %v154_v25, %v86_v23  ;;  %v182_v28 = vmul.f32 %v177_v26, %v109_v24 }
  0xb1   :  { %236 = vmatmul.f32.gmra.mxu0 %v181_v27  ;;  %259 = vmatmul.f32.gmra.mxu1 %v182_v28 }
 0x126   :  { %v234_v30 = vpop.f32.mrf.mxu0  ;;  %v257_v32 = vpop.f32.mrf.mxu1 }
 0x127   :  { %v258_v33 = vadd.f32 %v257_v32, %v234_v30 }
 0x129   :  { %v263_v34 = vadd.f32 %v258_v33, %v183_v31 }
 0x12b   :  { %265 = vst.msk [vmem:[#allocation2] sm:$0xff] %vm31_vm0, %v263_v34 }
 0x12e   :  { %v237_v36 = vpop.f32.mrf.mxu0  ;;  %v260_v38 = vpop.f32.mrf.mxu1 }
 0x12f   :  { %v261_v39 = vadd.f32 %v260_v38, %v237_v36 }
 0x131   :  { %v264_v40 = vadd.f32 %v261_v39, %v184_v37 }
 0x132   :  { %v272_v42 = vld [vmem:[#allocation2] sm:$0xff] }
 0x133   :  { %266 = vst.msk [vmem:[#allocation2 + $0x8] sm:$0xff] %vm31_vm0, %v264_v40  ;;  %v274_v43 = vadd.f32 %v272_v42, %v448_v20 }
 0x135   :  { %v280_v44 = vadd.f32 %v314_v41, %v274_v43 }
 0x137   :  { %282 = vst.msk [vmem:[#allocation3] sm:$0xff] %vm31_vm0, %v280_v44 }
 0x13a   :  { %v273_v45 = vld [vmem:[#allocation2 + $0x8] sm:$0xff] }
 0x13b   :  { %v275_v46 = vadd.f32 %v273_v45, %v499_v35 }
 0x13d   :  { %v281_v47 = vadd.f32 %v314_v41, %v275_v46 }
 0x13f   :  { %283 = vst.msk [vmem:[#allocation3 + $0x8] sm:$0xff] %vm31_vm0, %v281_v47 }
 0x140   :  { %296 = dma.vmem_to_hbm [thread:$0]  %s289_s13, 256, %s291_s16, [#allocation4], %s343_s6, %s343_s6, %s344_s17  }
 0x141   :  { %339 = dma.done.wait [#allocation4], 256  }
 0x142   :  { %340 = vsyncadd [#allocation4], 4294967040 }
 0x143   :  { %301 = vsyncpa [#allocation4], 1 }

</bundles_post_ra>
